<compile_context>
chip_gen: v6e
topology: v6e:2x2x1
jax: 0.10.0
libtpu: 0.0.40
codegen_flags: <defaults>
</compile_context>

<pallas_src>
import functools

import jax
import jax.numpy as jnp
from jax.experimental import pallas as pl
from jax.experimental.pallas import tpu as pltpu

IGNORE_INDEX = -100
GAMMA = 2.0
# TODO(synk): optional per-class `weight` tensor (default None in the module) is
# not implemented; with weight=None the math below matches exactly.


def _focal_loss_kernel(logits_ref, target_ref, out_ref, *, gamma, ignore_index,
                       n_rows, tile_n):
    x = logits_ref[...].astype(jnp.float32)            # (tile_n, C)
    t = target_ref[...]                                 # (tile_n, 1) int32

    # Numerically-stable logsumexp along the class (lane) axis.
    m = jnp.max(x, axis=-1, keepdims=True)
    z = x - m
    lse = jnp.log(jnp.sum(jnp.exp(z), axis=-1, keepdims=True))   # (tile_n, 1)

    # Gather z[target] via one-hot compare (no full logp materialization).
    cls = jax.lax.broadcasted_iota(jnp.int32, x.shape, 1)
    onehot = cls == t
    tgt_z = jnp.sum(jnp.where(onehot, z, 0.0), axis=-1, keepdims=True)  # (tile_n,1)
    tgt_logp = tgt_z - lse

    # Row validity: inside the real array (last tile may read OOB garbage rows)
    # and not the ignore_index.  Padded target rows are ignore_index anyway.
    row = pl.program_id(0) * tile_n + jax.lax.broadcasted_iota(jnp.int32, t.shape, 0)
    valid = jnp.logical_and(row < n_rows, t != ignore_index)

    ce = jnp.where(valid, -tgt_logp, 0.0)                # (tile_n, 1)
    pt = jnp.exp(-ce)
    d = 1.0 - pt

    g = float(gamma)
    if g.is_integer() and 0 <= int(g) <= 8:
        # Integer-gamma fast path: repeated VPU multiplies, no pow() on the EUP.
        w = jnp.ones_like(d)
        for _ in range(int(g)):
            w = w * d
    else:
        w = jnp.power(jnp.maximum(d, 0.0), g)
    focal = w * ce                                       # (tile_n, 1)

    # Lane-dense per-tile partial sum block (unmasked (8,128) store).
    s = jnp.sum(focal)
    out_ref[...] = jnp.full(out_ref.shape, s, dtype=jnp.float32)


def focal_loss(logits, target, *, gamma=GAMMA, weight=None,
               ignore_index=IGNORE_INDEX, reduction="mean", tile_rows=None):
    """logits: (N, C) float32/bfloat16; target: (N,) int -> scalar float32."""
    if weight is not None:
        raise NotImplementedError(
            "per-class weight not supported")  # TODO(synk): per-class weights

    n, c = logits.shape
    itemsize = jnp.dtype(logits.dtype).itemsize

    # Pick a row tile: logits block ~2 MiB, multiple of 8, no larger than the
    # (8-rounded) problem.  Keeps double-buffered footprint small enough for
    # v7x's 64 MiB VMEM while still amortizing per-grid-step overhead.
    if tile_rows is None:
        tile_rows = (2 * 1024 * 1024) // max(c * itemsize, 1)
    tile_n = max(8, (int(tile_rows) // 8) * 8)
    n_pad8 = ((n + 7) // 8) * 8
    tile_n = min(tile_n, n_pad8)

    num_tiles = (n + tile_n - 1) // tile_n
    n_padded = num_tiles * tile_n

    # Pad targets (cheap) with ignore_index so padded / OOB rows contribute 0.
    t = target.reshape(n).astype(jnp.int32)
    t = jnp.pad(t, (0, n_padded - n), constant_values=ignore_index)
    t = t.reshape(n_padded, 1)

    kernel = functools.partial(
        _focal_loss_kernel, gamma=gamma, ignore_index=ignore_index,
        n_rows=n, tile_n=tile_n)

    partials = pl.pallas_call(
        kernel,
        out_shape=jax.ShapeDtypeStruct((num_tiles, 8, 128), jnp.float32),
        grid_spec=pltpu.PrefetchScalarGridSpec(
            num_scalar_prefetch=0,
            grid=(num_tiles,),
            in_specs=[
                pl.BlockSpec((tile_n, c), lambda i: (i, 0)),
                pl.BlockSpec((tile_n, 1), lambda i: (i, 0)),
            ],
            out_specs=pl.BlockSpec((1, 8, 128), lambda i: (i, 0, 0)),
        ),
        compiler_params=pltpu.CompilerParams(
            dimension_semantics=("parallel",),
        ),
    )(logits, t)

    total = jnp.sum(partials[:, 0, 0])
    if reduction == "mean":
        return total / jnp.float32(n)
    elif reduction == "sum":
        return total
    else:
        # TODO(synk): reduction='none' needs a per-row output; not implemented.
        raise NotImplementedError("reduction='none' not supported")


def _focal_loss_ref(logits, target, *, gamma=GAMMA, ignore_index=IGNORE_INDEX):
    logp = jax.nn.log_softmax(logits.astype(jnp.float32), axis=-1)
    safe_t = jnp.where(target == ignore_index, 0, target)
    ce = -jnp.take_along_axis(logp, safe_t[:, None], axis=-1)[:, 0]
    ce = jnp.where(target == ignore_index, 0.0, ce)
    pt = jnp.exp(-ce)
    focal = (1.0 - pt) ** gamma * ce
    return focal.mean()


if __name__ == "__main__":
    key = jax.random.PRNGKey(0)

    # Case 1: shapes implied by the module (batch=2, seq=8 event-prediction
    # logits over 32 classes -> flatten to N=16 rows).
    k1, k2, k3, k4 = jax.random.split(key, 4)
    batch, seq, num_classes = 2, 8, 32
    n1 = batch * seq
    logits1 = jax.random.normal(k1, (n1, num_classes), dtype=jnp.float32)
    target1 = jax.random.randint(k2, (n1,), 0, num_classes, dtype=jnp.int32)
    target1 = target1.at[3].set(IGNORE_INDEX)   # exercise ignore_index

    out1 = jax.block_until_ready(focal_loss(logits1, target1))
    ref1 = _focal_loss_ref(logits1, target1)
    assert jnp.allclose(out1, ref1, rtol=1e-5, atol=1e-6), (out1, ref1)

    # Case 2: multi-tile grid with a ragged last tile (N not a multiple of the
    # row tile) to exercise the padding / OOB-row masking path.
    n2 = 50
    logits2 = jax.random.normal(k3, (n2, num_classes), dtype=jnp.float32)
    target2 = jax.random.randint(k4, (n2,), 0, num_classes, dtype=jnp.int32)
    target2 = target2.at[7].set(IGNORE_INDEX)
    target2 = target2.at[49].set(IGNORE_INDEX)

    out2 = jax.block_until_ready(focal_loss(logits2, target2, tile_rows=16))
    ref2 = _focal_loss_ref(logits2, target2)
    assert jnp.allclose(out2, ref2, rtol=1e-5, atol=1e-6), (out2, ref2)

    print("KERNEL_OK")
</pallas_src>

<mosaic_0001>
module attributes {stable_mosaic.version = 11 : i64} {
  func.func @_focal_loss_kernel(%arg0: i32, %arg1: memref<16x32xf32, #tpu.memory_space<vmem>>, %arg2: memref<16x1xi32, #tpu.memory_space<vmem>>, %arg3: memref<1x8x128xf32, #tpu.memory_space<vmem>>) attributes {dimension_semantics = [#tpu.dimension_semantics<parallel>], iteration_bounds = array<i64: 1>, scalar_prefetch = 0 : i64, scratch_operands = 0 : i64, tpu.core_type = #tpu.core_type<tc>, window_params = [{transform_indices = @transform_0, window_bounds = array<i64: 16, 32>}, {transform_indices = @transform_1, window_bounds = array<i64: 16, 1>}, {transform_indices = @transform_2, window_bounds = array<i64: 1, 8, 128>}]} {
    %c0 = arith.constant 0 : index
    %c0_0 = arith.constant 0 : index
    %0 = vector.load %arg1[%c0, %c0_0] : memref<16x32xf32, #tpu.memory_space<vmem>>, vector<16x32xf32>
    %c0_1 = arith.constant 0 : index
    %c0_2 = arith.constant 0 : index
    %1 = vector.load %arg2[%c0_1, %c0_2] : memref<16x1xi32, #tpu.memory_space<vmem>>, vector<16x1xi32>
    %cst = arith.constant dense<0xFF800000> : vector<16xf32>
    %2 = vector.multi_reduction <maximumf>, %0, %cst [1] : vector<16x32xf32> to vector<16xf32>
    %3 = vector.shape_cast %2 : vector<16xf32> to vector<16x1xf32>
    %4 = vector.broadcast %3 : vector<16x1xf32> to vector<16x32xf32>
    %5 = arith.subf %0, %4 : vector<16x32xf32>
    %6 = math.exp %5 : vector<16x32xf32>
    %cst_3 = arith.constant dense<0.000000e+00> : vector<16xf32>
    %7 = vector.multi_reduction <add>, %6, %cst_3 [1] : vector<16x32xf32> to vector<16xf32>
    %8 = vector.shape_cast %7 : vector<16xf32> to vector<16x1xf32>
    %9 = math.log %8 : vector<16x1xf32>
    %10 = tpu.iota {dimensions = array<i32: 1>} : vector<16x32xi32>
    %11 = vector.broadcast %1 : vector<16x1xi32> to vector<16x32xi32>
    %12 = arith.cmpi eq, %10, %11 : vector<16x32xi32>
    %cst_4 = arith.constant 0.000000e+00 : f32
    %13 = vector.broadcast %cst_4 : f32 to vector<16x32xf32>
    %14 = arith.select %12, %5, %13 : vector<16x32xi1>, vector<16x32xf32>
    %cst_5 = arith.constant dense<0.000000e+00> : vector<16xf32>
    %15 = vector.multi_reduction <add>, %14, %cst_5 [1] : vector<16x32xf32> to vector<16xf32>
    %16 = vector.shape_cast %15 : vector<16xf32> to vector<16x1xf32>
    %17 = arith.subf %16, %9 : vector<16x1xf32>
    %c16_i32 = arith.constant 16 : i32
    %18 = arith.muli %arg0, %c16_i32 : i32
    %19 = tpu.iota {dimensions = array<i32: 0>} : vector<16x1xi32>
    %20 = vector.broadcast %18 : i32 to vector<16x1xi32>
    %21 = arith.addi %20, %19 : vector<16x1xi32>
    %c16_i32_6 = arith.constant 16 : i32
    %22 = vector.broadcast %c16_i32_6 : i32 to vector<16x1xi32>
    %23 = arith.cmpi slt, %21, %22 : vector<16x1xi32>
    %c-100_i32 = arith.constant -100 : i32
    %24 = vector.broadcast %c-100_i32 : i32 to vector<16x1xi32>
    %25 = arith.cmpi ne, %1, %24 : vector<16x1xi32>
    %26 = arith.andi %23, %25 : vector<16x1xi1>
    %cst_7 = arith.constant 0.000000e+00 : f32
    %27 = vector.broadcast %cst_7 : f32 to vector<16x1xf32>
    %28 = arith.subf %27, %17 : vector<16x1xf32>
    %cst_8 = arith.constant 0.000000e+00 : f32
    %29 = vector.broadcast %cst_8 : f32 to vector<16x1xf32>
    %30 = arith.select %26, %28, %29 : vector<16x1xi1>, vector<16x1xf32>
    %cst_9 = arith.constant 0.000000e+00 : f32
    %31 = vector.broadcast %cst_9 : f32 to vector<16x1xf32>
    %32 = arith.subf %31, %30 : vector<16x1xf32>
    %33 = math.exp %32 : vector<16x1xf32>
    %cst_10 = arith.constant 1.000000e+00 : f32
    %34 = vector.broadcast %cst_10 : f32 to vector<16x1xf32>
    %35 = arith.subf %34, %33 : vector<16x1xf32>
    %cst_11 = arith.constant 1.000000e+00 : f32
    %36 = vector.broadcast %cst_11 : f32 to vector<16x1xf32>
    %37 = arith.mulf %36, %35 : vector<16x1xf32>
    %38 = arith.mulf %37, %35 : vector<16x1xf32>
    %39 = arith.mulf %38, %30 : vector<16x1xf32>
    %40 = vector.shape_cast %39 : vector<16x1xf32> to vector<1x16x1xf32>
    %cst_12 = arith.constant dense<0.000000e+00> : vector<1xf32>
    %41 = vector.multi_reduction <add>, %40, %cst_12 [1, 2] : vector<1x16x1xf32> to vector<1xf32>
    %42 = vector.shape_cast %41 : vector<1xf32> to vector<1x1x1xf32>
    %43 = vector.extract %42[0, 0, 0] : f32 from vector<1x1x1xf32>
    %44 = vector.broadcast %43 : f32 to vector<1x8x128xf32>
    %c0_13 = arith.constant 0 : index
    %c0_14 = arith.constant 0 : index
    %c0_15 = arith.constant 0 : index
    %45 = vector.load %arg3[%c0_13, %c0_14, %c0_15] : memref<1x8x128xf32, #tpu.memory_space<vmem>>, vector<1x8x128xf32>
    tpu.vector_store %arg3[%c0_13, %c0_14, %c0_15], %44 {strides = array<i32>} : memref<1x8x128xf32, #tpu.memory_space<vmem>>, vector<1x8x128xf32>,
    return
  }
  func.func @transform_0(%arg0: i32) -> (i32, i32) {
    %c0_i32 = arith.constant 0 : i32
    %c0_i32_0 = arith.constant 0 : i32
    return %arg0, %c0_i32 : i32, i32
  }
  func.func @transform_1(%arg0: i32) -> (i32, i32) {
    %c0_i32 = arith.constant 0 : i32
    %c0_i32_0 = arith.constant 0 : i32
    return %arg0, %c0_i32 : i32, i32
  }
  func.func @transform_2(%arg0: i32) -> (i32, i32, i32) {
    %c0_i32 = arith.constant 0 : i32
    %c0_i32_0 = arith.constant 0 : i32
    %c0_i32_1 = arith.constant 0 : i32
    return %arg0, %c0_i32, %c0_i32_0 : i32, i32, i32
  }
}

</mosaic_0001>

<bundles_post_ra>
// kernel: tpu_custom_call.1
= control target key start
LH: loop header
LB: loop body
LE: loop exit
PB: predicated region body
PF: predicated region fallthrough
CT: control target
= control target key end

     0   :  { %vm16_vm0 = vcmask 261120   ;;  %v157_v4 = vmov 0   ;;  %s195_s0 = inlined_call_operand.vmem [shape: f32[16,32], index: 0, kind: input, shape index: {}]   ;;  %s196_s1 = inlined_call_operand.vmem [shape: s32[16,1], index: 1, kind: input, shape index: {}]   ;;  %s197_s2 = inlined_call_operand.hbm [shape: f32[1,8,128], index: 2, kind: output, shape index: {}]  }
   0x1   :  { %v12_v0 = vld [vmem:[%s195_s0] sm:$0xff]  ;;  %v13_v1 = vld [vmem:[%s195_s0 + $0x8] sm:$0xff]  ;;  %121 = vset.pattern.permute.xlu1 %v157_v4  ;;  %122 = vset.pattern.permute.xlu0 %v157_v4 }
   0x2   :  { %v14_v2 = vld [vmem:[%s196_s1] sm:$0xff]  ;;  %v17_v3 = vsel %vm16_vm0, %v12_v0, -inf }
   0x3   :  { %7 = vsyncpa [#allocation3], 0  ;;  %18 = vmax.xlane.f32.xlu0 %v17_v3  ;;  %42 = vperm.xlu1 %121, %v14_v2   ;;  %v20_v5 = vsel %vm16_vm0, %v13_v1, -inf  ;;  %v15_v6 = vld [vmem:[%s196_s1 + $0x8] sm:$0xff]  ;;  %v39_v13 = vlaneseq  ;;  %vm68_vm3 = vcmp.ne.s32.totalorder %v14_v2, 4294967196  ;;  %vm88_vm5 = vcmask 7168  }
   0x4   :  { %vm69_vm4 = vcmp.ne.s32.totalorder %v15_v6, 4294967196  ;;  %s158_s0 = smov [#allocation2]  }
   0x5   :  { %v40_v15 = vand.u32 127, %v39_v13  ;;  %s109_s1 = sshll.u32 %s158_s0, 4  ;;  %s110_s1 = int_to_ptr.vmem [resolvable:$true] %s109_s1 }
   0x6   :  { %s135_s18 = scalar_lea.vmem %s110_s1, 128  ;;  %p140_p1 = scmp.lt.s32.totalorder %s110_s1, %s110_s1 }
   0x7   :  { %21 = vmax.xlane.f32.xlu0 %v20_v5  ;;  %45 = vperm.xlu1 %121, %v15_v6   ;;  %p136_p0 = scmp.ne.s32.totalorder %s110_s1, %s135_s18  ;;  %p141_p2 = scmp.lt.s32.totalorder %s135_s18, %s135_s18 }
   0x9   :  { %p142_p3 = por %p141_p2, %p140_p1 }
   0xb   :  { %p143_p4 = pnand %p142_p3, %p136_p0 }
  0x7e   :  { %v43_v14 = vpop.permute.xlu1 %42 }
  0x7f   :  { %vm47_vm1 = vcmp.eq.s32.totalorder %v40_v15, %v43_v14 }
  0x82   :  { %v46_v17 = vpop.permute.xlu1 %45 }
  0x83   :  { %vm48_vm2 = vcmp.eq.s32.totalorder %v40_v15, %v46_v17 }
  0x8c   :  { %v19_v7 = vpop.xlane.xlu0 %18 }
  0x8d   :  { %v23_v8 = vsub.f32 %v12_v0, %v19_v7 }
  0x8f   :  { %v25_v9 = vmul.f32 1.442695, %v23_v8  ;;  %v49_v19 = vsel %vm47_vm1, %v23_v8, 0.0 }
  0x90   :  { %v22_v10 = vpop.xlane.xlu0 %21  ;;  %v51_v21 = vsel %vm16_vm0, %v49_v19, 0.0 }
  0x91   :  { %123 = vpow2.f32 %v25_v9  ;;  %v24_v11 = vsub.f32 %v13_v1, %v22_v10 }
  0x93   :  { %v27_v12 = vmul.f32 1.442695, %v24_v11  ;;  %v50_v23 = vsel %vm48_vm2, %v24_v11, 0.0 }
  0x94   :  { %v54_v24 = vsel %vm16_vm0, %v50_v23, 0.0 }
  0x95   :  { %125 = vpow2.f32 %v27_v12 }
  0x9e   :  { %v124_v16 = vpop.eup %123 }
  0x9f   :  { %v29_v18 = vsel %vm16_vm0, %v124_v16, 0.0 }
  0xa0   :  { %30 = vadd.xlane.f32.xlu0 %v29_v18 }
  0xa2   :  { %v126_v20 = vpop.eup %125 }
  0xa3   :  { %v32_v22 = vsel %vm16_vm0, %v126_v20, 0.0 }
  0xa4   :  { %52 = vadd.xlane.f32.xlu0 %v51_v21  ;;  %33 = vadd.xlane.f32.xlu1 %v32_v22 }
  0xa8   :  { %55 = vadd.xlane.f32.xlu0 %v54_v24 }
 0x129   :  { %v31_v25 = vpop.xlane.xlu0 %30 }
 0x12a   :  { %127 = vlog2.f32 %v31_v25 }
 0x12d   :  { %v34_v26 = vpop.xlane.xlu1 %33  ;;  %v53_v28 = vpop.xlane.xlu0 %52 }
 0x12e   :  { %129 = vlog2.f32 %v34_v26 }
 0x131   :  { %v56_v34 = vpop.xlane.xlu0 %55 }
 0x137   :  { %v128_v27 = vpop.eup %127 }
 0x138   :  { %v36_v29 = vmul.f32 0.6931472, %v128_v27 }
 0x13a   :  { %v57_v30 = vsub.f32 %v53_v28, %v36_v29 }
 0x13b   :  { %v130_v31 = vpop.eup %129 }
 0x13c   :  { %v72_v32 = vsub.f32 0.0, %v57_v30  ;;  %v38_v33 = vmul.f32 0.6931472, %v130_v31 }
 0x13e   :  { %v74_v35 = vsel %vm68_vm3, %v72_v32, 0.0  ;;  %v58_v36 = vsub.f32 %v56_v34, %v38_v33 }
 0x13f   :  { %v76_v37 = vsub.f32 0.0, %v74_v35 }
 0x140   :  { %v73_v38 = vsub.f32 0.0, %v58_v36 }
 0x141   :  { %v78_v39 = vmul.f32 1.442695, %v76_v37 }
 0x142   :  { %v75_v40 = vsel %vm69_vm4, %v73_v38, 0.0 }
 0x143   :  { %131 = vpow2.f32 %v78_v39  ;;  %v77_v41 = vsub.f32 0.0, %v75_v40 }
 0x145   :  { %v80_v42 = vmul.f32 1.442695, %v77_v41 }
 0x147   :  { %133 = vpow2.f32 %v80_v42 }
 0x150   :  { %v132_v43 = vpop.eup %131 }
 0x151   :  { %v82_v44 = vsub.f32 1.0, %v132_v43 }
 0x153   :  { %v84_v45 = vmul.f32 %v82_v44, %v82_v44 }
 0x154   :  { %v134_v46 = vpop.eup %133 }
 0x155   :  { %v83_v47 = vsub.f32 1.0, %v134_v46  ;;  %v86_v48 = vmul.f32 %v84_v45, %v74_v35 }
 0x157   :  { %v85_v49 = vmul.f32 %v83_v47, %v83_v47  ;;  %v89_v51 = vsel %vm88_vm5, %v86_v48, 0.0 }
 0x159   :  { %v87_v50 = vmul.f32 %v85_v49, %v75_v40 }
 0x15b   :  { %v90_v52 = vsel %vm88_vm5, %v87_v50, 0.0 }
 0x15c   :  { %v91_v53 = vadd.f32 %v90_v52, %v89_v51 }
 0x15e   :  { %92 = vadd.xlane.f32.xlu0 %v91_v53 }
 0x1e7   :  { %v93_v54 = vpop.xlane.xlu0 %92 }
 0x1e8   :  { %v94_v55 = vrot.slane %v93_v54, 4 }
 0x1ea   :  { %v95_v56 = vadd.f32 %v94_v55, %v93_v54 }
 0x1ec   :  { %v96_v57 = vrot.slane %v95_v56, 2 }
 0x1ee   :  { %v97_v58 = vadd.f32 %v96_v57, %v95_v56 }
 0x1f0   :  { %v98_v59 = vrot.slane %v97_v58, 1 }
 0x1f2   :  { %v99_v60 = vadd.f32 %v98_v59, %v97_v58 }
 0x1f4   :  { %117 = vpush %v99_v60 }
 0x225   :  { %s118_s17 = spop %117 }
 0x226   :  { %v101_v61 = vstv %s118_s17 }
 0x227   :  { %102 = vst [vmem:[#allocation2] sm:$0xff] %v101_v61 }
 0x228   :  { %146 = shalt.err (!%p143_p4)
}
 0x229   :  { %112 = dma.vmem_to_hbm [thread:$0]  %s110_s1, 128, %s197_s2, [#allocation3]  }
 0x22a   :  { %155 = dma.done.wait [#allocation3], 128  }
 0x22b   :  { %156 = vsyncadd [#allocation3], 4294967168 }
 0x22c   :  { %116 = vsyncpa [#allocation3], 1 }

</bundles_post_ra>
